<compile_context>
chip_gen: v5e
topology: v5e:2x2
jax: 0.10.0
libtpu: 0.0.40
codegen_flags: <defaults>
</compile_context>

<pallas_src>
import functools

import jax
import jax.numpy as jnp
from jax.experimental import pallas as pl
from jax.experimental.pallas import tpu as pltpu


def _round_up(n, m):
    return ((n + m - 1) // m) * m


def _tv_loss_jax(x, tv_loss_weight=1.0):
    """Pure-JAX reference mirroring the PyTorch TVLoss.forward (also used as
    fallback for degenerate / oversized-slice shapes)."""
    B, C, H, W = x.shape
    count_h = C * (H - 1) * W
    count_w = C * H * (W - 1)
    xf = x.astype(jnp.float32)
    h_tv = jnp.sum((xf[:, :, 1:, :] - xf[:, :, : H - 1, :]) ** 2)
    w_tv = jnp.sum((xf[:, :, :, 1:] - xf[:, :, :, : W - 1]) ** 2)
    return tv_loss_weight * 2.0 * (h_tv / count_h + w_tv / count_w) / B


def _tv_partial_kernel(x_ref, out_ref, *, block_rows, total_rows, height, width):
    """Partial TV sums for one block of flattened channel slices.

    x_ref:   (block_rows, H*W) VMEM block, native dtype, lane-dense layout.
    out_ref: (1, 2) SMEM block -> [sum(dh^2), sum(dw^2)] for this block.
    """
    i = pl.program_id(0)
    hw = height * width

    x = x_ref[...].astype(jnp.float32)                     # (tc, H*W) f32

    # Height diffs: in row-major flattening, x[h+1, w] - x[h, w] is a shift by
    # W.  All (H-1)*W flat positions are valid -> no mask required.
    dh = x[:, width:] - x[:, : hw - width]                 # (tc, (H-1)*W)
    h_pc = jnp.sum(dh * dh, axis=-1, keepdims=True)        # (tc, 1)

    # Width diffs: flat shift by 1; pairs straddling a row boundary
    # (w == W-1) are excluded by a position-only mask (shared by all rows).
    dw = x[:, 1:] - x[:, : hw - 1]                         # (tc, H*W - 1)
    col = jax.lax.broadcasted_iota(jnp.int32, (1, hw - 1), 1)
    in_row = (col + 1) % width != 0                        # (1, H*W - 1)
    w_pc = jnp.sum(jnp.where(in_row, dw * dw, 0.0), axis=-1, keepdims=True)

    # Ragged last block: out-of-bounds rows hold unspecified data.  Mask on the
    # per-row reduced sums (select, not multiply, so NaN/Inf cannot leak).
    row = jax.lax.broadcasted_iota(jnp.int32, (block_rows, 1), 0)
    valid = (row + i * block_rows) < total_rows            # (tc, 1)

    out_ref[0, 0] = jnp.sum(jnp.where(valid, h_pc, 0.0))
    out_ref[0, 1] = jnp.sum(jnp.where(valid, w_pc, 0.0))


def tv_loss(x, tv_loss_weight=1.0, *, max_block_rows=None):
    """TV loss matching PyTorch TVLoss.forward.  x: (B, C, H, W), float dtype."""
    B, C, H, W = x.shape
    count_h = C * (H - 1) * W   # tensor_size(x[:, :, 1:, :])
    count_w = C * H * (W - 1)   # tensor_size(x[:, :, :, 1:])
    total = B * C
    hw = H * W

    if H < 2 or W < 2:
        # Degenerate spatial dim: the PyTorch reference divides by zero here
        # too; keep exact parity via the XLA path (zero-size slices don't lower).
        return _tv_loss_jax(x, tv_loss_weight)

    itemsize = x.dtype.itemsize
    packing = max(1, 4 // itemsize)
    sub_in = 8 * packing                    # sublane tile: 8 (f32) / 16 (bf16)
    lanes_pad = _round_up(hw, 128)

    # Generation-aware VMEM budget (v7x: 64 MiB/TC, v5e/v6e: 128 MiB).
    try:
        vmem_cap = int(pltpu.get_tpu_info().vmem_capacity_bytes)
    except Exception:
        vmem_cap = 64 * 1024 * 1024
    vmem_limit = min(vmem_cap // 2, 48 * 1024 * 1024)
    usable = int(vmem_limit * 0.8)

    # Per-row padded cost: 2x native-dtype input (double-buffered pipeline)
    # + ~8x f32 working set (cast + shifted-slice temporaries + squares).
    per_row = lanes_pad * (2 * itemsize + 8 * 4)
    fit_rows = (usable // per_row) // sub_in * sub_in
    if max_block_rows is not None:
        fit_rows = min(fit_rows, max(sub_in, (max_block_rows // sub_in) * sub_in))

    if fit_rows < sub_in:
        # TODO(synk): a single (H, W) slice too large for the VMEM budget needs
        # a second grid axis over H with a 1-row halo; fall back to XLA for now.
        return _tv_loss_jax(x, tv_loss_weight)

    tc = int(min(fit_rows, total))          # block-dim == full dim is also legal
    num_blocks = pl.cdiv(total, tc)

    xf = x.reshape(total, hw)               # metadata-only, lane-dense layout

    kernel = functools.partial(
        _tv_partial_kernel,
        block_rows=tc, total_rows=total, height=H, width=W,
    )

    flops = 6 * total * hw                  # sub + mul + add for dh and dw
    bytes_accessed = total * hw * itemsize + num_blocks * 2 * 4

    partials = pl.pallas_call(
        kernel,
        out_shape=jax.ShapeDtypeStruct((num_blocks, 2), jnp.float32),
        grid_spec=pltpu.PrefetchScalarGridSpec(
            num_scalar_prefetch=0,
            grid=(num_blocks,),
            in_specs=[pl.BlockSpec((tc, hw), lambda i: (i, 0))],
            out_specs=pl.BlockSpec(
                (1, 2),
                lambda i: (i, 0),
                memory_space=pltpu.MemorySpace.SMEM,
            ),
        ),
        compiler_params=pltpu.CompilerParams(
            dimension_semantics=("parallel",),       # no cross-step state
            vmem_limit_bytes=vmem_limit,
        ),
        cost_estimate=pl.CostEstimate(
            flops=flops, transcendentals=0, bytes_accessed=bytes_accessed
        ),
    )(xf)

    h_tv = jnp.sum(partials[:, 0])
    w_tv = jnp.sum(partials[:, 1])
    return (
        jnp.float32(tv_loss_weight)
        * 2.0
        * (h_tv / jnp.float32(count_h) + w_tv / jnp.float32(count_w))
        / jnp.float32(B)
    )


if __name__ == "__main__":
    key = jax.random.PRNGKey(0)
    k0, k1 = jax.random.split(key)

    # Primary case: (B, C, H, W) = (2, 4, 16, 16), f32, single block.
    x = jax.random.normal(k0, (2, 4, 16, 16), dtype=jnp.float32)
    out = jax.block_until_ready(tv_loss(x, tv_loss_weight=1.0))
    ref = _tv_loss_jax(x, tv_loss_weight=1.0)
    assert jnp.allclose(out, ref, rtol=1e-5, atol=1e-6), (out, ref)

    # Ragged-grid path: 9 channel slices, 8 rows/block -> last block is masked.
    x2 = jax.random.normal(k1, (3, 3, 16, 16), dtype=jnp.float32)
    out2 = jax.block_until_ready(tv_loss(x2, tv_loss_weight=1.0, max_block_rows=8))
    ref2 = _tv_loss_jax(x2, tv_loss_weight=1.0)
    assert jnp.allclose(out2, ref2, rtol=1e-5, atol=1e-6), (out2, ref2)

    # bf16 streaming path (half the HBM bytes), f32 accumulation in-kernel.
    xb = x.astype(jnp.bfloat16)
    out_b = jax.block_until_ready(tv_loss(xb, tv_loss_weight=0.5))
    ref_b = _tv_loss_jax(xb, tv_loss_weight=0.5)
    assert jnp.allclose(out_b, ref_b, rtol=1e-3, atol=1e-4), (out_b, ref_b)

    # bf16 + ragged tail: 18 slices, 16 rows/block (bf16 sublane tile = 16).
    x3 = jax.random.normal(k1, (3, 6, 16, 16), dtype=jnp.bfloat16)
    out3 = jax.block_until_ready(tv_loss(x3, tv_loss_weight=1.0, max_block_rows=16))
    ref3 = _tv_loss_jax(x3, tv_loss_weight=1.0)
    assert jnp.allclose(out3, ref3, rtol=1e-3, atol=1e-4), (out3, ref3)

    print("KERNEL_OK")
</pallas_src>

<mosaic_0001>
module attributes {stable_mosaic.version = 11 : i64} {
  func.func @_tv_partial_kernel(%arg0: i32, %arg1: memref<8x256xf32, #tpu.memory_space<vmem>>, %arg2: memref<1x2xf32, #tpu.memory_space<smem>>) attributes {dimension_semantics = [#tpu.dimension_semantics<parallel>], iteration_bounds = array<i64: 1>, scalar_prefetch = 0 : i64, scratch_operands = 0 : i64, tpu.core_type = #tpu.core_type<tc>, window_params = [{transform_indices = @transform_0, window_bounds = array<i64: 8, 256>}, {transform_indices = @transform_1, window_bounds = array<i64: 1, 2>}]} {
    %c0 = arith.constant 0 : index
    %c0_0 = arith.constant 0 : index
    %0 = vector.load %arg1[%c0, %c0_0] : memref<8x256xf32, #tpu.memory_space<vmem>>, vector<8x256xf32>
    %1 = vector.extract_strided_slice %0 {offsets = [0, 16], sizes = [8, 240], strides = [1, 1]} : vector<8x256xf32> to vector<8x240xf32>
    %2 = vector.extract_strided_slice %0 {offsets = [0, 0], sizes = [8, 240], strides = [1, 1]} : vector<8x256xf32> to vector<8x240xf32>
    %3 = arith.subf %1, %2 : vector<8x240xf32>
    %4 = arith.mulf %3, %3 : vector<8x240xf32>
    %cst = arith.constant dense<0.000000e+00> : vector<8xf32>
    %5 = vector.multi_reduction <add>, %4, %cst [1] : vector<8x240xf32> to vector<8xf32>
    %6 = vector.shape_cast %5 : vector<8xf32> to vector<8x1xf32>
    %7 = vector.extract_strided_slice %0 {offsets = [0, 1], sizes = [8, 255], strides = [1, 1]} : vector<8x256xf32> to vector<8x255xf32>
    %8 = vector.extract_strided_slice %0 {offsets = [0, 0], sizes = [8, 255], strides = [1, 1]} : vector<8x256xf32> to vector<8x255xf32>
    %9 = arith.subf %7, %8 : vector<8x255xf32>
    %10 = tpu.iota {dimensions = array<i32: 1>} : vector<1x255xi32>
    %c1_i32 = arith.constant 1 : i32
    %11 = vector.broadcast %c1_i32 : i32 to vector<1x255xi32>
    %12 = arith.addi %10, %11 : vector<1x255xi32>
    %c16_i32 = arith.constant 16 : i32
    %c0_i32 = arith.constant 0 : i32
    %13 = arith.cmpi eq, %c16_i32, %c0_i32 : i32
    %c1_i32_1 = arith.constant 1 : i32
    %14 = arith.select %13, %c1_i32_1, %c16_i32 : i32
    %15 = vector.broadcast %14 : i32 to vector<1x255xi32>
    %16 = arith.remsi %12, %15 : vector<1x255xi32>
    %c0_i32_2 = arith.constant 0 : i32
    %17 = vector.broadcast %c0_i32_2 : i32 to vector<1x255xi32>
    %18 = arith.cmpi ne, %16, %17 : vector<1x255xi32>
    %c0_i32_3 = arith.constant 0 : i32
    %19 = vector.broadcast %c0_i32_3 : i32 to vector<1x255xi32>
    %20 = arith.cmpi slt, %16, %19 : vector<1x255xi32>
    %c0_i32_4 = arith.constant 0 : i32
    %21 = arith.cmpi slt, %14, %c0_i32_4 : i32
    %22 = vector.broadcast %21 : i1 to vector<1x255xi1>
    %23 = vector.broadcast %22 : vector<1x255xi1> to vector<1x255xi1>
    %24 = arith.xori %20, %23 : vector<1x255xi1>
    %25 = arith.andi %24, %18 : vector<1x255xi1>
    %26 = vector.broadcast %14 : i32 to vector<1x255xi32>
    %27 = arith.addi %16, %26 : vector<1x255xi32>
    %28 = arith.select %25, %27, %16 : vector<1x255xi1>, vector<1x255xi32>
    %c0_i32_5 = arith.constant 0 : i32
    %29 = vector.broadcast %c0_i32_5 : i32 to vector<1x255xi32>
    %30 = arith.cmpi ne, %28, %29 : vector<1x255xi32>
    %31 = arith.mulf %9, %9 : vector<8x255xf32>
    %cst_6 = arith.constant 0.000000e+00 : f32
    %32 = vector.shape_cast %30 : vector<1x255xi1> to vector<1x255xi1>
    %33 = vector.broadcast %32 : vector<1x255xi1> to vector<8x255xi1>
    %34 = vector.broadcast %cst_6 : f32 to vector<8x255xf32>
    %35 = arith.select %33, %31, %34 : vector<8x255xi1>, vector<8x255xf32>
    %cst_7 = arith.constant dense<0.000000e+00> : vector<8xf32>
    %36 = vector.multi_reduction <add>, %35, %cst_7 [1] : vector<8x255xf32> to vector<8xf32>
    %37 = vector.shape_cast %36 : vector<8xf32> to vector<8x1xf32>
    %38 = tpu.iota {dimensions = array<i32: 0>} : vector<8x1xi32>
    %c8_i32 = arith.constant 8 : i32
    %39 = arith.muli %arg0, %c8_i32 : i32
    %40 = vector.broadcast %39 : i32 to vector<8x1xi32>
    %41 = arith.addi %38, %40 : vector<8x1xi32>
    %c8_i32_8 = arith.constant 8 : i32
    %42 = vector.broadcast %c8_i32_8 : i32 to vector<8x1xi32>
    %43 = arith.cmpi slt, %41, %42 : vector<8x1xi32>
    %cst_9 = arith.constant 0.000000e+00 : f32
    %44 = vector.broadcast %cst_9 : f32 to vector<8x1xf32>
    %45 = arith.select %43, %6, %44 : vector<8x1xi1>, vector<8x1xf32>
    %46 = vector.shape_cast %45 : vector<8x1xf32> to vector<1x8x1xf32>
    %cst_10 = arith.constant dense<0.000000e+00> : vector<1xf32>
    %47 = vector.multi_reduction <add>, %46, %cst_10 [1, 2] : vector<1x8x1xf32> to vector<1xf32>
    %48 = vector.shape_cast %47 : vector<1xf32> to vector<1x1x1xf32>
    %49 = vector.extract %48[0, 0, 0] : f32 from vector<1x1x1xf32>
    %c0_11 = arith.constant 0 : index
    %c0_12 = arith.constant 0 : index
    %50 = memref.load %arg2[%c0_11, %c0_12] : memref<1x2xf32, #tpu.memory_space<smem>>
    memref.store %49, %arg2[%c0_11, %c0_12] : memref<1x2xf32, #tpu.memory_space<smem>>
    %cst_13 = arith.constant 0.000000e+00 : f32
    %51 = vector.broadcast %cst_13 : f32 to vector<8x1xf32>
    %52 = arith.select %43, %37, %51 : vector<8x1xi1>, vector<8x1xf32>
    %53 = vector.shape_cast %52 : vector<8x1xf32> to vector<1x8x1xf32>
    %cst_14 = arith.constant dense<0.000000e+00> : vector<1xf32>
    %54 = vector.multi_reduction <add>, %53, %cst_14 [1, 2] : vector<1x8x1xf32> to vector<1xf32>
    %55 = vector.shape_cast %54 : vector<1xf32> to vector<1x1x1xf32>
    %56 = vector.extract %55[0, 0, 0] : f32 from vector<1x1x1xf32>
    %c0_15 = arith.constant 0 : index
    %c1 = arith.constant 1 : index
    %57 = memref.load %arg2[%c0_15, %c1] : memref<1x2xf32, #tpu.memory_space<smem>>
    memref.store %56, %arg2[%c0_15, %c1] : memref<1x2xf32, #tpu.memory_space<smem>>
    return
  }
  func.func @transform_0(%arg0: i32) -> (i32, i32) {
    %c0_i32 = arith.constant 0 : i32
    %c0_i32_0 = arith.constant 0 : i32
    return %arg0, %c0_i32 : i32, i32
  }
  func.func @transform_1(%arg0: i32) -> (i32, i32) {
    %c0_i32 = arith.constant 0 : i32
    %c0_i32_0 = arith.constant 0 : i32
    return %arg0, %c0_i32 : i32, i32
  }
}

</mosaic_0001>

<bundles_post_ra>
// kernel: tpu_custom_call.1
= control target key start
LH: loop header
LB: loop body
LE: loop exit
PB: predicated region body
PF: predicated region fallthrough
CT: control target
= control target key end

     0   :  { %6 = vsyncpa [#allocation3], 0  ;;  %s239_s0 = inlined_call_operand.hbm [shape: f32[8,256], index: 0, kind: input, shape index: {}]   ;;  %s240_s1 = inlined_call_operand.hbm [shape: f32[1,2], index: 1, kind: output, shape index: {}]  }
   0x1   :  { %7 = vsyncpa [#allocation4], 0  ;;  %s13_s8 = sshll.u32 %s239_s0, 4  ;;  %s214_s9 = smov [#allocation2]   ;;  %s14_s8 = int_to_ptr.hbm [resolvable:$true] %s13_s8 }
   0x2   :  { %s15_s10 = sshll.u32 %s214_s9, 4  ;;  %s16_s10 = int_to_ptr.vmem [resolvable:$true] %s15_s10 }
   0x3   :  { %18 = dma.hbm_to_vmem [thread:$0]  %s14_s8, 256, %s16_s10, [#allocation3]  }
   0x4   :  { %210 = dma.done.wait [#allocation3], 256  }
   0x5   :  { %211 = vsyncadd [#allocation3], 4294967040  ;;  %v23_v0 = vld [vmem:[#allocation2] sm:$0xff]  ;;  %s215_s11 = smov 16   ;;  %s216_s12 = smov 1   ;;  %v24_v1 = vld [vmem:[#allocation2 + $0x8] sm:$0xff]  ;;  %v63_v16 = vlaneseq }
   0x6   :  { %27 = vrot.lane.b32.xlu1 %v23_v0, %s215_s11  ;;  %53 = vrot.lane.b32.xlu0 %v23_v0, %s216_s12  ;;  %s217_s0 = smov 112   ;;  %s218_s13 = smov 127   ;;  %vm31_vm0 = vcmask 130048   ;;  %vm57_vm1 = vcmask 7168   ;;  %vm106_vm3 = vcmask 1039360   ;;  %vm45_vm5 = vcmask 916480  }
   0x7   :  { %v64_v17 = vand.u32 127, %v63_v16  ;;  %s153_s16 = sshll.u32 %s240_s1, 4  ;;  %s219_s19 = smov [#allocation5]   ;;  %s154_s16 = int_to_ptr.hbm [resolvable:$true] %s153_s16 }
   0x9   :  { %v65_v18 = vadd.s32 128, %v64_v17  ;;  %v66_v21 = vadd.s32 1, %v64_v17 }
   0xb   :  { %v67_v19 = vadd.s32 1, %v65_v18  ;;  %v72_v23 = vand.u32 15, %v66_v21 }
   0xd   :  { %v79_v22 = vand.u32 15, %v67_v19  ;;  %vm92_vm4 = vcmp.ne.s32.totalorder %v72_v23, 0 }
   0xe   :  { %29 = vrot.lane.b32.xlu1 %v24_v1, %s215_s11  ;;  %55 = vrot.lane.b32.xlu0 %v24_v1, %s216_s12 }
   0xf   :  { %vm93_vm2 = vcmp.ne.s32.totalorder %v79_v22, 0 }
  0x78   :  { %v28_v2 = vpop.permute.xlu1 %27  ;;  %v54_v3 = vpop.permute.xlu0 %53 }
  0x79   :  { %v35_v4 = vsub.f32 %v23_v0, %v28_v2  ;;  %v61_v5 = vsub.f32 %v23_v0, %v54_v3 }
  0x7b   :  { %v37_v6 = vmul.f32 %v35_v4, %v35_v4  ;;  %v94_v7 = vmul.f32 %v61_v5, %v61_v5 }
  0x7d   :  { %41 = vrot.lane.b32.xlu0 %v37_v6, %s217_s0  ;;  %102 = vrot.lane.b32.xlu2 %v94_v7, %s218_s13 }
  0x80   :  { %v30_v8 = vpop.permute.xlu1 %29  ;;  %v56_v9 = vpop.permute.xlu0 %55 }
  0x81   :  { %v32_v10 = vsel %vm31_vm0, %v28_v2, %v30_v8  ;;  %v58_v11 = vsel %vm57_vm1, %v54_v3, %v56_v9 }
  0x82   :  { %v36_v12 = vsub.f32 %v24_v1, %v32_v10  ;;  %v62_v13 = vsub.f32 %v24_v1, %v58_v11 }
  0x84   :  { %v38_v14 = vmul.f32 %v36_v12, %v36_v12  ;;  %v95_v15 = vmul.f32 %v62_v13, %v62_v13 }
  0x86   :  { %43 = vrot.lane.b32.xlu1 %v38_v14, %s217_s0  ;;  %104 = vrot.lane.b32.xlu2 %v95_v15, %s218_s13 }
  0xd7   :  { %v103_v20 = vpop.permute.xlu2 %102 }
  0xe0   :  { %v105_v24 = vpop.permute.xlu2 %104 }
  0xe1   :  { %v107_v25 = vsel %vm106_vm3, %v103_v20, %v105_v24  ;;  %v111_v26 = vsel %vm93_vm2, %v105_v24, 0.0 }
  0xe2   :  { %v110_v27 = vsel %vm92_vm4, %v107_v25, 0.0  ;;  %v112_v28 = vsel %vm106_vm3, %v111_v26, 0.0 }
  0xe3   :  { %v113_v29 = vadd.f32 %v112_v28, %v110_v27 }
  0xe5   :  { %114 = vadd.xlane.f32.xlu0 %v113_v29 }
  0xef   :  { %v42_v30 = vpop.permute.xlu0 %41 }
  0xf8   :  { %v44_v31 = vpop.permute.xlu1 %43 }
  0xf9   :  { %v46_v32 = vsel %vm45_vm5, %v42_v30, %v44_v31  ;;  %v49_v33 = vsel %vm45_vm5, %v44_v31, 0.0 }
  0xfa   :  { %v50_v34 = vadd.f32 %v49_v33, %v46_v32 }
  0xfc   :  { %51 = vadd.xlane.f32.xlu2 %v50_v34 }
 0x158   :  { %v115_v35 = vpop.xlane.xlu0 %114 }
 0x159   :  { %v136_v36 = vsel %vm57_vm1, %v115_v35, 0.0 }
 0x15a   :  { %137 = vadd.xlane.f32.xlu2 %v136_v36 }
 0x16f   :  { %v52_v37 = vpop.xlane.xlu2 %51 }
 0x170   :  { %v123_v38 = vsel %vm57_vm1, %v52_v37, 0.0 }
 0x171   :  { %124 = vadd.xlane.f32.xlu1 %v123_v38 }
 0x1cd   :  { %v138_v39 = vpop.xlane.xlu2 %137 }
 0x1ce   :  { %v139_v40 = vrot.slane %v138_v39, 4 }
 0x1d0   :  { %v140_v41 = vadd.f32 %v139_v40, %v138_v39 }
 0x1d2   :  { %v141_v42 = vrot.slane %v140_v41, 2 }
 0x1d4   :  { %v142_v46 = vadd.f32 %v141_v42, %v140_v41 }
 0x1d6   :  { %v143_v49 = vrot.slane %v142_v46, 1 }
 0x1d8   :  { %v144_v52 = vadd.f32 %v143_v49, %v142_v46 }
 0x1e4   :  { %v125_v43 = vpop.xlane.xlu1 %124 }
 0x1e5   :  { %v126_v44 = vrot.slane %v125_v43, 4 }
 0x1e7   :  { %v127_v45 = vadd.f32 %v126_v44, %v125_v43 }
 0x1e9   :  { %v128_v47 = vrot.slane %v127_v45, 2 }
 0x1eb   :  { %v129_v48 = vadd.f32 %v128_v47, %v127_v45 }
 0x1ed   :  { %v130_v50 = vrot.slane %v129_v48, 1 }
 0x1ef   :  { %v131_v51 = vadd.f32 %v130_v50, %v129_v48 }
 0x1f1   :  { %164 = vpush %v131_v51 }
 0x1f2   :  { %166 = vpush %v144_v52 }
 0x222   :  { %s165_s17 = spop %164 }
 0x223   :  { %134 = sst [smem:[#allocation5]] %s165_s17  ;;  %s167_s18 = spop %166 }
 0x224   :  { %147 = sst [smem:[#allocation5 + $0x1]] %s167_s18 }
 0x225   :  { %156 = dma.smem_to_hbm %s219_s19, 16, %s154_s16, [#allocation4]  }
 0x226   :  { %212 = dma.done.wait [#allocation4], 16  }
 0x227   :  { %213 = vsyncadd [#allocation4], 4294967280 }
 0x228   :  { %161 = sfence }
 0x229   :  { %162 = vsyncpa [#allocation3], 1 }
 0x22a   :  { %163 = vsyncpa [#allocation4], 1 }

</bundles_post_ra>
